<compile_context>
chip_gen: v5e
topology: v5e:2x2
jax: 0.10.0
libtpu: 0.0.40
codegen_flags: <defaults>
</compile_context>

<pallas_src>
import functools

import jax
import jax.numpy as jnp
from jax.experimental import pallas as pl
from jax.experimental.pallas import tpu as pltpu

# ---------------- static model configuration --------------------------------
N_CHANNELS = 4
N_TIME = 64
N_CLASSES = 2
CT = N_CHANNELS * N_TIME          # flattened (channel, time) contraction length


# ---------------- kernel ------------------------------------------------------
def avg_nhlp_kernel(x_ref, w_ref, b_ref, out_ref):
    # x_ref : (TILE_B, C*T)      batch on sublanes, flattened sample on lanes
    # w_ref : (C*T, N_CLASSES)   1/C-scaled, channel-tiled, transposed linear weight
    # b_ref : (1, N_CLASSES)
    # out   : (TILE_B, N_CLASSES)
    out_ref[...] = (
        jnp.dot(x_ref[...], w_ref[...], preferred_element_type=jnp.float32)
        + b_ref[...]
    ).astype(out_ref.dtype)


# ---------------- wrapper ----------------------------------------------------
@functools.partial(jax.jit, static_argnames=("tile_b",))
def avg_nhlp_forward(x, weight, bias, *, tile_b=4096):
    """x: (B, n_channels, n_time_points) f32
       weight: (n_classes, n_time_points)   bias: (n_classes,)"""
    B, C, T = x.shape
    assert (C, T) == (N_CHANNELS, N_TIME)

    # ---- tile-size selection (all static: shapes are trace-time constants) ----
    tile_b = max(8, (int(tile_b) // 8) * 8)          # sublane tile, multiple of 8
    tile_b = min(tile_b, pl.cdiv(B, 8) * 8)          # no larger than 8-rounded batch
    if B >= 256:
        # keep >= 2 grid steps so both v7x TensorCores get work on the "parallel" axis
        tile_b = min(tile_b, max(128, pl.cdiv(pl.cdiv(B, 2), 8) * 8))
    tile_b = max(8, tile_b)

    # Free, contiguous reshape: batch on sublanes, (channel, time) flattened on lanes.
    x_flat = x.reshape(B, CT)

    # Fold the channel average (1/C) and the flatten into the transposed weight:
    #   w_full_T[ch*T + t, c] = W[c, t] / C   ->   out = x_flat @ w_full_T + bias
    w_full_t = jnp.tile(weight.astype(jnp.float32).T / C, (C, 1))   # (C*T, n_classes)
    b_row = bias.astype(jnp.float32).reshape(1, N_CLASSES)

    out = pl.pallas_call(
        avg_nhlp_kernel,
        out_shape=jax.ShapeDtypeStruct((B, N_CLASSES), jnp.float32),
        grid=(pl.cdiv(B, tile_b),),                  # partial tail block is masked
        in_specs=[
            pl.BlockSpec((tile_b, CT), lambda i: (i, 0)),
            pl.BlockSpec((CT, N_CLASSES), lambda i: (0, 0)),
            pl.BlockSpec((1, N_CLASSES), lambda i: (0, 0)),
        ],
        out_specs=pl.BlockSpec((tile_b, N_CLASSES), lambda i: (i, 0)),
        compiler_params=pltpu.CompilerParams(
            dimension_semantics=("parallel",),
        ),
    )(x_flat, w_full_t, b_row)

    return out                                        # (B, n_classes), torch layout


# ---------------- pure-JAX reference (numerical cross-check) -----------------
def avg_nhlp_reference(x, weight, bias):
    avg = jnp.mean(x, axis=1)                                  # AvgPool2d((C,1)) + view
    return jnp.dot(avg, weight.T, precision=jax.lax.Precision.HIGHEST) + bias


# ---------------- main --------------------------------------------------------
if __name__ == "__main__":
    key = jax.random.PRNGKey(0)
    kx, kw, kb = jax.random.split(key, 3)

    B = 2
    x = jax.random.normal(kx, (B, N_CHANNELS, N_TIME), jnp.float32)
    # torch.nn.Linear default init: U(-1/sqrt(fan_in), 1/sqrt(fan_in))
    bound = 1.0 / (N_TIME ** 0.5)
    weight = jax.random.uniform(kw, (N_CLASSES, N_TIME), jnp.float32, -bound, bound)
    bias = jax.random.uniform(kb, (N_CLASSES,), jnp.float32, -bound, bound)

    out = jax.block_until_ready(avg_nhlp_forward(x, weight, bias))
    assert out.shape == (B, N_CLASSES), out.shape

    ref = avg_nhlp_reference(x, weight, bias)
    if not bool(jnp.allclose(out, ref, atol=1e-3, rtol=1e-3)):
        raise SystemExit(f"mismatch: max abs err = {float(jnp.max(jnp.abs(out - ref)))}")

    print("KERNEL_OK")
</pallas_src>

<mosaic_0001>
module attributes {stable_mosaic.version = 11 : i64} {
  func.func @avg_nhlp_kernel(%arg0: i32, %arg1: memref<8x256xf32, #tpu.memory_space<vmem>>, %arg2: memref<256x2xf32, #tpu.memory_space<vmem>>, %arg3: memref<1x2xf32, #tpu.memory_space<vmem>>, %arg4: memref<8x2xf32, #tpu.memory_space<vmem>>) attributes {dimension_semantics = [#tpu.dimension_semantics<parallel>], iteration_bounds = array<i64: 1>, scalar_prefetch = 0 : i64, scratch_operands = 0 : i64, tpu.core_type = #tpu.core_type<tc>, window_params = [{transform_indices = @transform_0, window_bounds = array<i64: 8, 256>}, {pipeline_mode = #tpu.pipeline_mode<synchronous>, transform_indices = @transform_1, window_bounds = array<i64: 256, 2>}, {pipeline_mode = #tpu.pipeline_mode<synchronous>, transform_indices = @transform_2, window_bounds = array<i64: 1, 2>}, {transform_indices = @transform_3, window_bounds = array<i64: 8, 2>}]} {
    %c0 = arith.constant 0 : index
    %c0_0 = arith.constant 0 : index
    %0 = vector.load %arg1[%c0, %c0_0] : memref<8x256xf32, #tpu.memory_space<vmem>>, vector<8x256xf32>
    %c0_1 = arith.constant 0 : index
    %c0_2 = arith.constant 0 : index
    %1 = vector.load %arg2[%c0_1, %c0_2] : memref<256x2xf32, #tpu.memory_space<vmem>>, vector<256x2xf32>
    %cst = arith.constant dense<0.000000e+00> : vector<8x2xf32>
    %2 = tpu.matmul %0, %1, %cst {dimension_numbers = #tpu.dot_dimension_numbers<[1], [0], [0], [1], [0, 0, 1, 1], [], []>} : vector<8x256xf32>, vector<256x2xf32>, vector<8x2xf32> -> vector<8x2xf32>
    %c0_3 = arith.constant 0 : index
    %c0_4 = arith.constant 0 : index
    %3 = vector.load %arg3[%c0_3, %c0_4] : memref<1x2xf32, #tpu.memory_space<vmem>>, vector<1x2xf32>
    %4 = vector.broadcast %3 : vector<1x2xf32> to vector<8x2xf32>
    %5 = arith.addf %2, %4 : vector<8x2xf32>
    %c0_5 = arith.constant 0 : index
    %c0_6 = arith.constant 0 : index
    %6 = vector.load %arg4[%c0_5, %c0_6] : memref<8x2xf32, #tpu.memory_space<vmem>>, vector<8x2xf32>
    tpu.vector_store %arg4[%c0_5, %c0_6], %5 {strides = array<i32>} : memref<8x2xf32, #tpu.memory_space<vmem>>, vector<8x2xf32>,
    return
  }
  func.func @transform_0(%arg0: i32) -> (i32, i32) {
    %c0_i32 = arith.constant 0 : i32
    %c0_i32_0 = arith.constant 0 : i32
    return %arg0, %c0_i32 : i32, i32
  }
  func.func @transform_1(%arg0: i32) -> (i32, i32) {
    %c0_i32 = arith.constant 0 : i32
    %c0_i32_0 = arith.constant 0 : i32
    %c0_i32_1 = arith.constant 0 : i32
    return %c0_i32, %c0_i32_0 : i32, i32
  }
  func.func @transform_2(%arg0: i32) -> (i32, i32) {
    %c0_i32 = arith.constant 0 : i32
    %c0_i32_0 = arith.constant 0 : i32
    %c0_i32_1 = arith.constant 0 : i32
    return %c0_i32, %c0_i32_0 : i32, i32
  }
  func.func @transform_3(%arg0: i32) -> (i32, i32) {
    %c0_i32 = arith.constant 0 : i32
    %c0_i32_0 = arith.constant 0 : i32
    return %arg0, %c0_i32 : i32, i32
  }
}

</mosaic_0001>

<bundles_post_ra>
// kernel: avg_nhlp_forward.1
= control target key start
LH: loop header
LB: loop body
LE: loop exit
PB: predicated region body
PF: predicated region fallthrough
CT: control target
= control target key end

     0   :  { %8 = vsyncpa [#allocation3], 0  ;;  %vm110_vm0 = vcmask 15360   ;;  %s297_s0 = inlined_call_operand.vmem [shape: f32[2,256], index: 0, kind: input, shape index: {}]   ;;  %s298_s1 = inlined_call_operand.vmem [shape: f32[256,2], index: 1, kind: input, shape index: {}]   ;;  %s299_s2 = inlined_call_operand.vmem [shape: f32[1,2], index: 2, kind: input, shape index: {}]   ;;  %s300_s3 = inlined_call_operand.hbm [shape: f32[2,2], index: 3, kind: output, shape index: {}]  }
   0x1   :  { %v34_v0 = vld [vmem:[%s298_s1 + $0x78] sm:$0xff]  ;;  %v33_v1 = vld [vmem:[%s298_s1 + $0x70] sm:$0xff]  ;;  %v32_v4 = vld [vmem:[%s298_s1 + $0x68] sm:$0xff] }
   0x2   :  { %70 = vmatpush.msra.mxu0 %v34_v0  ;;  %v50_v2 = vld [vmem:[%s298_s1 + $0xf8] sm:$0xff]  ;;  %v49_v3 = vld [vmem:[%s298_s1 + $0xf0] sm:$0xff]  ;;  %v48_v5 = vld [vmem:[%s298_s1 + $0xe8] sm:$0xff] }
   0x3   :  { %90 = vmatpush.msra.mxu1 %v50_v2  ;;  %v31_v6 = vld [vmem:[%s298_s1 + $0x60] sm:$0xff]  ;;  %v30_v8 = vld [vmem:[%s298_s1 + $0x58] sm:$0xff]  ;;  %v29_v10 = vld [vmem:[%s298_s1 + $0x50] sm:$0xff] }
   0x4   :  { %71 = vmatpush.msra.mxu0 %v33_v1  ;;  %v47_v7 = vld [vmem:[%s298_s1 + $0xe0] sm:$0xff]  ;;  %v46_v9 = vld [vmem:[%s298_s1 + $0xd8] sm:$0xff]  ;;  %v45_v11 = vld [vmem:[%s298_s1 + $0xd0] sm:$0xff] }
   0x5   :  { %91 = vmatpush.msra.mxu1 %v49_v3  ;;  %v28_v12 = vld [vmem:[%s298_s1 + $0x48] sm:$0xff]  ;;  %v27_v13 = vld [vmem:[%s298_s1 + $0x40] sm:$0xff]  ;;  %v26_v20 = vld [vmem:[%s298_s1 + $0x38] sm:$0xff] }
   0x6   :  { %72 = vmatpush.msra.mxu0 %v32_v4  ;;  %v15_v14 = vld [vmem:[%s297_s0] sm:$0xf]  ;;  %v44_v15 = vld [vmem:[%s298_s1 + $0xc8] sm:$0xff]  ;;  %v16_v16 = vld [vmem:[%s297_s0 + $0x4] sm:$0xf] }
   0x7   :  { %92 = vmatpush.msra.mxu1 %v48_v5  ;;  %v17_v17 = vld [vmem:[%s297_s0 + $0x8] sm:$0xf]  ;;  %v18_v18 = vld [vmem:[%s297_s0 + $0xc] sm:$0xf]  ;;  %59 = vst [vmem:[#allocation1] ss:$4 sm:$0xff] %v15_v14 }
   0x8   :  { %73 = vmatpush.msra.mxu0 %v31_v6  ;;  %v43_v19 = vld [vmem:[%s298_s1 + $0xc0] sm:$0xff]  ;;  %61 = vst [vmem:[#allocation1 + $0x1] ss:$4 sm:$0xff] %v16_v16  ;;  %v42_v21 = vld [vmem:[%s298_s1 + $0xb8] sm:$0xff]  ;;  %v25_v22 = vld [vmem:[%s298_s1 + $0x30] sm:$0xff] }
   0x9   :  { %93 = vmatpush.msra.mxu1 %v47_v7  ;;  %63 = vst [vmem:[#allocation1 + $0x2] ss:$4 sm:$0xff] %v17_v17  ;;  %v41_v23 = vld [vmem:[%s298_s1 + $0xb0] sm:$0xff]  ;;  %v24_v24 = vld [vmem:[%s298_s1 + $0x28] sm:$0xff]  ;;  %v23_v26 = vld [vmem:[%s298_s1 + $0x20] sm:$0xff] }
   0xa   :  { %74 = vmatpush.msra.mxu0 %v30_v8  ;;  %65 = vst [vmem:[#allocation1 + $0x3] ss:$4 sm:$0xff] %v18_v18  ;;  %v40_v25 = vld [vmem:[%s298_s1 + $0xa8] sm:$0xff]  ;;  %v39_v27 = vld [vmem:[%s298_s1 + $0xa0] sm:$0xff]  ;;  %v22_v28 = vld [vmem:[%s298_s1 + $0x18] sm:$0xff] }
   0xb   :  { %94 = vmatpush.msra.mxu1 %v46_v9  ;;  %v38_v29 = vld [vmem:[%s298_s1 + $0x98] sm:$0xff]  ;;  %v21_v30 = vld [vmem:[%s298_s1 + $0x10] sm:$0xff]  ;;  %v20_v32 = vld [vmem:[%s298_s1 + $0x8] sm:$0xff] }
   0xc   :  { %75 = vmatpush.msra.mxu0 %v29_v10  ;;  %v37_v31 = vld [vmem:[%s298_s1 + $0x90] sm:$0xff]  ;;  %v36_v33 = vld [vmem:[%s298_s1 + $0x88] sm:$0xff]  ;;  %v19_v34 = vld [vmem:[%s298_s1] sm:$0xff] }
   0xd   :  { %95 = vmatpush.msra.mxu1 %v45_v11  ;;  %v35_v36 = vld [vmem:[%s298_s1 + $0x80] sm:$0xff] }
   0xe   :  { %76 = vmatpush.msra.mxu0 %v28_v12  ;;  %v133_v38 = vld [vmem:[%s299_s2] ss:$0 sm:$0xff] }
   0xf   :  { %96 = vmatpush.msra.mxu1 %v44_v15 }
  0x10   :  { %77 = vmatpush.msra.mxu0 %v27_v13 }
  0x11   :  { %97 = vmatpush.msra.mxu1 %v43_v19  ;;  %v66_v35 = vld.sshfl [vmem:[#allocation1] sm:$0xff pattern:$0x73625140]  ;;  %v67_v37 = vld.sshfl [vmem:[#allocation1 + $0x8] sm:$0xff pattern:$0x73625140] }
  0x12   :  { %78 = vmatpush.msra.mxu0 %v26_v20 }
  0x13   :  { %98 = vmatpush.msra.mxu1 %v42_v21 }
  0x14   :  { %79 = vmatpush.msra.mxu0 %v25_v22 }
  0x15   :  { %99 = vmatpush.msra.mxu1 %v41_v23 }
  0x16   :  { %80 = vmatpush.msra.mxu0 %v24_v24 }
  0x17   :  { %100 = vmatpush.msra.mxu1 %v40_v25 }
  0x18   :  { %81 = vmatpush.msra.mxu0 %v23_v26 }
  0x19   :  { %101 = vmatpush.msra.mxu1 %v39_v27 }
  0x1a   :  { %82 = vmatpush.msra.mxu0 %v22_v28 }
  0x1b   :  { %102 = vmatpush.msra.mxu1 %v38_v29 }
  0x1c   :  { %83 = vmatpush.msra.mxu0 %v21_v30 }
  0x1d   :  { %103 = vmatpush.msra.mxu1 %v37_v31 }
  0x1e   :  { %84 = vmatpush.msra.mxu0 %v20_v32 }
  0x1f   :  { %104 = vmatpush.msra.mxu1 %v36_v33 }
  0x20   :  { %85 = vmatpush.msra.mxu0 %v19_v34 }
  0x21   :  { %86 = vmatmul.f32.vlgmr.msra.gmra.mxu0 %v66_v35  ;;  %105 = vmatpush.msra.mxu1 %v35_v36 }
  0x22   :  { %106 = vmatmul.f32.vlgmr.msra.gmra.mxu1 %v67_v37 }
  0x9e   :  { %v87_v39 = vpop.f32.mrf.mxu0 }
  0x9f   :  { %v88_v40 = vadd.f32 %v133_v38, %v87_v39  ;;  %v107_v41 = vpop.f32.mrf.mxu1 }
  0xa1   :  { %v108_v42 = vadd.f32 %v107_v41, %v88_v40 }
  0xa3   :  { %111 = vst.msk [vmem:[#allocation2] sm:$0xff] %vm110_vm0, %v108_v42 }
  0xa4   :  { %115 = vsyncadd [#allocation3], 96  ;;  %s118_s1 = sshll.u32 %s300_s3, 4  ;;  %s160_s5 = smov [#allocation2]   ;;  %s119_s1 = int_to_ptr.hbm [resolvable:$true] %s118_s1 }
  0xa5   :  { %s116_s6 = sshll.u32 %s160_s5, 4  ;;  %s161_s7 = smov 32   ;;  %s117_s6 = int_to_ptr.vmem [resolvable:$true] %s116_s6 }
  0xa6   :  { %s162_s8 = smov 2  }
  0xa7   :  { %124 = dma.vmem_to_hbm [thread:$0]  %s117_s6, 32, %s119_s1, [#allocation3], %s161_s7, %s161_s7, %s162_s8  }
  0xa8   :  { %158 = dma.done.wait [#allocation3], 128  }
  0xa9   :  { %159 = vsyncadd [#allocation3], 4294967168 }
  0xaa   :  { %129 = vsyncpa [#allocation3], 1 }

</bundles_post_ra>
